<compile_context>
chip_gen: v7x
topology: tpu7x:2x2x1
jax: 0.10.0
libtpu: 0.0.40
codegen_flags: <defaults>
</compile_context>

<pallas_src>
import jax
import jax.numpy as jnp
from jax.experimental import pallas as pl
from jax.experimental.pallas import tpu as pltpu


def _silu(x):
    return x * jax.nn.sigmoid(x)


def _round_up(x, m):
    return (x + m - 1) // m * m


def _vmem_capacity():
    try:
        return pltpu.get_tpu_info().vmem_capacity_bytes   # 64 MiB on v7x, 128 MiB v5e/v6e
    except Exception:                                      # pragma: no cover
        return 64 * 2 ** 20


def _pick_de_chunk(de_p):
    # Largest chunk <= 512 (multiple of 128) that divides the padded d_expert.
    for c in (512, 384, 256, 128):
        if de_p % c == 0:
            return min(c, de_p)
    return de_p


def _vmem_model(tm, dh_p, de_chunk, n_slots, out_itemsize):
    # Double-buffered streamed weights (fused gate|up + down), bf16.
    fixed = 2 * (dh_p * 2 * de_chunk + de_chunk * dh_p) * 2
    per_row = (dh_p * 2 * 2               # x tile (bf16, 2 buffers)
               + n_slots * 4 * 2          # routing weights (f32, 2 buffers)
               + dh_p * out_itemsize * 2  # output block
               + dh_p * 4                 # f32 accumulator scratch
               + 2 * de_chunk * 4         # fused gate|up f32 temp
               + de_chunk * 4             # h f32
               + de_chunk * 2             # h bf16
               + dh_p * 4)                # f32 down-proj partial
    return fixed, per_row, fixed + tm * per_row


def _choose_tm(T, dh_p, de_chunk, n_slots, out_itemsize, vmem_cap):
    fixed, per_row, _ = _vmem_model(0, dh_p, de_chunk, n_slots, out_itemsize)
    budget = int(vmem_cap * 0.7)
    tm_cap = max(16, (budget - fixed) // per_row)
    tm = min(1024, tm_cap, _round_up(T, 16))
    if tm >= 256:
        tm = (tm // 256) * 256            # fill the 256-wide MXU M dim (v6e/v7x)
    else:
        tm = max(16, (tm // 16) * 16)     # bf16 sublane packing
    # Prefer >= 2 token tiles so the "parallel" axis can load-balance 2 TCs.
    while tm > 16 and pl.cdiv(_round_up(T, 16), tm) < 2:
        tm = max(16, _round_up(tm // 2, 16))
    return tm


# ---------------------------------------------------------------------------
# Fused MoE kernel: grid = (token_tiles, expert_slots, de_chunks).
# Slot + chunk axes are reductions into a resident f32 scratch accumulator.
# ---------------------------------------------------------------------------
def _moe_kernel(ids_ref, cnt_ref, x_ref, w_ref, wgu_ref, wd_ref, o_ref, acc_ref):
    i = pl.program_id(0)      # token tile
    s = pl.program_id(1)      # compacted expert slot (reduction)
    c = pl.program_id(2)      # d_expert chunk (reduction)
    n_s = pl.num_programs(1)
    n_c = pl.num_programs(2)

    @pl.when(jnp.logical_and(s == 0, c == 0))
    def _init():
        acc_ref[...] = jnp.zeros_like(acc_ref)

    # Padded (inactive) slots: compute is skipped here and their weight
    # index_maps revisit the previous block, so no weight DMA is issued.
    @pl.when(s < cnt_ref[i])
    def _compute():
        de_c = wd_ref.shape[0]
        x = x_ref[...]                                               # (tm, dh) bf16
        gu = jnp.dot(x, wgu_ref[...], preferred_element_type=jnp.float32)
        gate = gu[:, :de_c]
        up = gu[:, de_c:]
        h = (gate * jax.nn.sigmoid(gate)) * up                       # f32 (v5e-safe)

        # Per-token routing weight of this slot (resident (tm, n_slots) block).
        w_tile = w_ref[...]
        col = jax.lax.broadcasted_iota(jnp.int32, w_tile.shape, 1)
        w_e = jnp.sum(jnp.where(col == s, w_tile, 0.0), axis=1, keepdims=True)

        if wd_ref.shape[0] <= wd_ref.shape[1]:
            # scale on the smaller (de_chunk) side
            part = jnp.dot((h * w_e).astype(wd_ref.dtype), wd_ref[...],
                           preferred_element_type=jnp.float32)
        else:
            part = w_e * jnp.dot(h.astype(wd_ref.dtype), wd_ref[...],
                                 preferred_element_type=jnp.float32)
        acc_ref[...] += part

    @pl.when(jnp.logical_and(s == n_s - 1, c == n_c - 1))
    def _store():
        o_ref[...] = acc_ref[...].astype(o_ref.dtype)


def _moe_pallas(slot_ids, counts, x_pad, w_slot, wgu_all, wd_all, *, tm, grid_t,
                n_slots, dh_p, de_p, de_chunk, out_dtype, experts_per_token):
    T_pad = x_pad.shape[0]
    n_dc = de_p // de_chunk
    out_itemsize = jnp.dtype(out_dtype).itemsize

    _, _, footprint = _vmem_model(tm, dh_p, de_chunk, n_slots, out_itemsize)
    vmem_cap = _vmem_capacity()
    vmem_limit = int(min(int(vmem_cap * 0.9),
                         max(footprint * 3 // 2 + (1 << 20), 16 << 20)))

    # Weight index maps: padded slots already carry the last real slot's expert
    # id, so returning it (and the last chunk index) makes Pallas revisit the
    # same block -> no DMA.
    if n_dc == 1:
        def wgu_map(i, s, c, ids, cnt):
            return (ids[i * n_slots + s], 0, 0)

        def wd_map(i, s, c, ids, cnt):
            return (ids[i * n_slots + s], 0, 0)
    else:
        def wgu_map(i, s, c, ids, cnt):
            cc = jnp.where(s < cnt[i], c, n_dc - 1)
            return (ids[i * n_slots + s], 0, cc)

        def wd_map(i, s, c, ids, cnt):
            cc = jnp.where(s < cnt[i], c, n_dc - 1)
            return (ids[i * n_slots + s], cc, 0)

    cost = pl.CostEstimate(
        flops=6 * T_pad * dh_p * de_p * experts_per_token,
        transcendentals=T_pad * de_p * experts_per_token,
        bytes_accessed=int(T_pad * dh_p * 2
                           + grid_t * experts_per_token * 3 * dh_p * de_p * 2
                           + T_pad * n_slots * 4
                           + T_pad * dh_p * out_itemsize),
    )

    return pl.pallas_call(
        _moe_kernel,
        out_shape=jax.ShapeDtypeStruct((T_pad, dh_p), out_dtype),
        grid_spec=pltpu.PrefetchScalarGridSpec(
            num_scalar_prefetch=2,
            grid=(grid_t, n_slots, n_dc),
            in_specs=[
                pl.BlockSpec((tm, dh_p), lambda i, s, c, ids, cnt: (i, 0)),     # x (resident)
                pl.BlockSpec((tm, n_slots), lambda i, s, c, ids, cnt: (i, 0)),  # slot weights
                pl.BlockSpec((None, dh_p, 2 * de_chunk), wgu_map),              # W_gate|W_up[e]
                pl.BlockSpec((None, de_chunk, dh_p), wd_map),                   # W_down[e]
            ],
            out_specs=pl.BlockSpec((tm, dh_p), lambda i, s, c, ids, cnt: (i, 0)),
            scratch_shapes=[pltpu.VMEM((tm, dh_p), jnp.float32)],
        ),
        compiler_params=pltpu.CompilerParams(
            dimension_semantics=("parallel", "arbitrary", "arbitrary"),
            vmem_limit_bytes=vmem_limit),
        cost_estimate=cost,
    )(slot_ids, counts, x_pad, w_slot, wgu_all, wd_all)


# ---------------------------------------------------------------------------
# Full MoE forward (glue: gating softmax/top-k, slot compaction, padding).
# ---------------------------------------------------------------------------
def moe_forward(x, params, config):
    B, S, dh = x.shape
    E = config["n_routed_experts"]
    top_k = config["n_experts_per_token"]
    n_shared = config["n_shared_experts"]
    de = config["d_expert"]
    n_slots = E + n_shared

    x_flat = x.reshape(-1, dh).astype(jnp.float32)
    T = x_flat.shape[0]

    # Gating: tiny matmul + softmax + top-k stays in plain JAX (f32).
    # TODO(synk): torch.topk / argsort-bincount sparse dispatch not ported to
    # Pallas; routing is a dense-but-DMA-skipped reduction over expert slots.
    logits = x_flat @ params["router_w"]
    scores = jax.nn.softmax(logits.astype(jnp.float32), axis=-1)
    topk_s, topk_i = jax.lax.top_k(scores, top_k)
    w_routed = jnp.zeros((T, E), jnp.float32).at[
        jnp.arange(T)[:, None], topk_i].add(topk_s)

    # Pad feature dims to multiples of 128 (lane-dense MXU and stores; exact).
    dh_p = _round_up(dh, 128)
    de_p = _round_up(de, 128)
    de_chunk = _pick_de_chunk(de_p)
    n_dc = de_p // de_chunk

    # Expert weights: routed + shared (shared expert folded in as n_shared
    # extra slots with implicit routing weight 1.0 by splitting its wide
    # SwiGLU intermediate into d_expert chunks -- exact).
    def pad_gu(w):   # (n, dh, de) -> (n, dh_p, de_p)
        return jnp.pad(w, ((0, 0), (0, dh_p - w.shape[1]), (0, de_p - w.shape[2])))

    def pad_d(w):    # (n, de, dh) -> (n, de_p, dh_p)
        return jnp.pad(w, ((0, 0), (0, de_p - w.shape[1]), (0, dh_p - w.shape[2])))

    sh_wg = params["shared_wg"].reshape(dh, n_shared, de).transpose(1, 0, 2)
    sh_wu = params["shared_wu"].reshape(dh, n_shared, de).transpose(1, 0, 2)
    sh_wd = params["shared_wd"].reshape(n_shared, de, dh)
    wg_all = pad_gu(jnp.concatenate([params["wg"], sh_wg], axis=0))
    wu_all = pad_gu(jnp.concatenate([params["wu"], sh_wu], axis=0))
    wd_all = pad_d(jnp.concatenate([params["wd"], sh_wd], axis=0)).astype(jnp.bfloat16)
    # Fused, chunk-interleaved gate|up: chunk cc holds [gate_cc | up_cc].
    wgu_all = jnp.concatenate(
        [wg_all.reshape(n_slots, dh_p, n_dc, de_chunk),
         wu_all.reshape(n_slots, dh_p, n_dc, de_chunk)],
        axis=-1).reshape(n_slots, dh_p, n_dc * 2 * de_chunk).astype(jnp.bfloat16)

    # Token tiling / padding.
    out_dtype = x.dtype
    tm = _choose_tm(T, dh_p, de_chunk, n_slots, jnp.dtype(out_dtype).itemsize,
                    _vmem_capacity())
    T_pad = _round_up(T, tm)
    grid_t = T_pad // tm
    pad_t = T_pad - T
    x_pad = jnp.pad(x_flat, ((0, pad_t), (0, dh_p - dh))).astype(jnp.bfloat16)
    w_routed_pad = jnp.pad(w_routed, ((0, pad_t), (0, 0)))

    # Per-tile compacted expert slots -> SMEM scalar prefetch.
    tile_any = (w_routed_pad.reshape(grid_t, tm, E) != 0.0).any(axis=1)  # (grid_t, E)
    n_act = tile_any.sum(axis=1).astype(jnp.int32)
    order = jnp.argsort(jnp.where(tile_any, 0, 1), axis=1)               # actives first
    slot_pos = jnp.arange(n_slots, dtype=jnp.int32)[None, :]
    routed_ids = jnp.take_along_axis(
        order, jnp.broadcast_to(jnp.minimum(slot_pos, E - 1), (grid_t, n_slots)),
        axis=1)
    shared_ids = E + jnp.clip(slot_pos - n_act[:, None], 0, n_shared - 1)
    slot_ids = jnp.where(slot_pos < n_act[:, None], routed_ids,
                         shared_ids).astype(jnp.int32)                   # (grid_t, n_slots)
    counts = (n_act + n_shared).astype(jnp.int32)                        # (grid_t,)

    # Per-slot routing weights, gathered per tile (shared slots -> 1.0).
    w_full = jnp.concatenate(
        [w_routed_pad, jnp.ones((T_pad, n_shared), jnp.float32)], axis=1)
    w_slot = jnp.take_along_axis(
        w_full.reshape(grid_t, tm, n_slots),
        jnp.broadcast_to(slot_ids[:, None, :], (grid_t, tm, n_slots)), axis=2)
    w_slot = jnp.where(slot_pos[:, None, :] < counts[:, None, None], w_slot, 0.0)
    w_slot = w_slot.reshape(T_pad, n_slots)

    out_pad = _moe_pallas(slot_ids.reshape(-1), counts, x_pad, w_slot, wgu_all,
                          wd_all, tm=tm, grid_t=grid_t, n_slots=n_slots,
                          dh_p=dh_p, de_p=de_p, de_chunk=de_chunk,
                          out_dtype=out_dtype,
                          experts_per_token=min(n_slots, top_k + n_shared))
    return out_pad[:T, :dh].reshape(B, S, dh)


# ---------------------------------------------------------------------------
# Plain-JAX f32 reference (mirrors the PyTorch module) for a sanity check.
# ---------------------------------------------------------------------------
def ref_forward(x, params, config):
    B, S, dh = x.shape
    E = config["n_routed_experts"]
    top_k = config["n_experts_per_token"]
    xf = x.reshape(-1, dh)
    T = xf.shape[0]

    def expert(xf, wg, wu, wd):
        return (_silu(xf @ wg) * (xf @ wu)) @ wd

    shared = expert(xf, params["shared_wg"], params["shared_wu"], params["shared_wd"])
    scores = jax.nn.softmax(xf @ params["router_w"], axis=-1)
    tk_s, tk_i = jax.lax.top_k(scores, top_k)
    w_dense = jnp.zeros((T, E), jnp.float32).at[jnp.arange(T)[:, None], tk_i].add(tk_s)

    routed = jnp.zeros_like(xf)
    for e in range(E):
        routed = routed + w_dense[:, e:e + 1] * expert(
            xf, params["wg"][e], params["wu"][e], params["wd"][e])
    return (routed + shared).reshape(B, S, dh)


def init_params(key, config):
    dh = config["d_hidden"]
    de = config["d_expert"]
    E = config["n_routed_experts"]
    d_shared = de * config["n_shared_experts"]
    ks = jax.random.split(key, 8)

    def lin(k, d_in, d_out):
        bound = 1.0 / jnp.sqrt(d_in)
        return jax.random.uniform(k, (d_in, d_out), jnp.float32, -bound, bound)

    def lin_stack(k, n, d_in, d_out):
        bound = 1.0 / jnp.sqrt(d_in)
        return jax.random.uniform(k, (n, d_in, d_out), jnp.float32, -bound, bound)

    return {
        "wg": lin_stack(ks[0], E, dh, de),
        "wu": lin_stack(ks[1], E, dh, de),
        "wd": lin_stack(ks[2], E, de, dh),
        "shared_wg": lin(ks[3], dh, d_shared),
        "shared_wu": lin(ks[4], dh, d_shared),
        "shared_wd": lin(ks[5], d_shared, dh),
        "router_w": lin(ks[6], dh, E),
    }


if __name__ == "__main__":
    config = {
        "d_hidden": 32,
        "d_expert": 32,
        "n_routed_experts": 4,
        "n_experts_per_token": 2,
        "n_shared_experts": 2,
    }
    B, S = 2, 16   # T = 32 tokens -> two 16-row token tiles

    key = jax.random.PRNGKey(0)
    k_params, k_x = jax.random.split(key)
    params = init_params(k_params, config)
    x = jax.random.normal(k_x, (B, S, config["d_hidden"]), jnp.float32)

    out = moe_forward(x, params, config)
    jax.block_until_ready(out)

    ref = ref_forward(x, params, config)
    assert out.shape == (B, S, config["d_hidden"])
    max_err = float(jnp.max(jnp.abs(out - ref)))
    assert jnp.allclose(out, ref, rtol=2e-2, atol=2e-2), (
        f"mismatch vs JAX reference (max abs err {max_err})")

    print("KERNEL_OK")
</pallas_src>

<mosaic_0001>
module attributes {stable_mosaic.version = 11 : i64} {
  func.func @_moe_kernel(%arg0: i32, %arg1: i32, %arg2: i32, %arg3: memref<12xi32, #tpu.memory_space<smem>>, %arg4: memref<2xi32, #tpu.memory_space<smem>>, %arg5: memref<16x128xbf16, #tpu.memory_space<vmem>>, %arg6: memref<16x6xf32, #tpu.memory_space<vmem>>, %arg7: memref<1x128x256xbf16, #tpu.memory_space<vmem>>, %arg8: memref<1x128x128xbf16, #tpu.memory_space<vmem>>, %arg9: memref<16x128xf32, #tpu.memory_space<vmem>>, %arg10: memref<16x128xf32, #tpu.memory_space<vmem>>) attributes {dimension_semantics = [#tpu.dimension_semantics<parallel>, #tpu.dimension_semantics<arbitrary>, #tpu.dimension_semantics<arbitrary>], iteration_bounds = array<i64: 2, 6, 1>, scalar_prefetch = 2 : i64, scratch_operands = 1 : i64, tpu.core_type = #tpu.core_type<tc>, window_params = [{transform_indices = @transform_0, window_bounds = array<i64: 16, 128>}, {transform_indices = @transform_1, window_bounds = array<i64: 16, 6>}, {transform_indices = @transform_2, window_bounds = array<i64: 1, 128, 256>}, {transform_indices = @transform_3, window_bounds = array<i64: 1, 128, 128>}, {transform_indices = @transform_4, window_bounds = array<i64: 16, 128>}]} {
    %c0_i32 = arith.constant 0 : i32
    %0 = arith.cmpi eq, %arg1, %c0_i32 : i32
    %c0_i32_0 = arith.constant 0 : i32
    %1 = arith.cmpi eq, %arg2, %c0_i32_0 : i32
    %2 = arith.andi %0, %1 : i1
    %3 = arith.extui %2 : i1 to i32
    %c0_i32_1 = arith.constant 0 : i32
    %4 = arith.cmpi ne, %3, %c0_i32_1 : i32
    scf.if %4 {
      %cst = arith.constant 0.000000e+00 : f32
      %15 = vector.broadcast %cst : f32 to vector<16x128xf32>
      %c0 = arith.constant 0 : index
      %c0_5 = arith.constant 0 : index
      %16 = vector.load %arg10[%c0, %c0_5] : memref<16x128xf32, #tpu.memory_space<vmem>>, vector<16x128xf32>
      tpu.vector_store %arg10[%c0, %c0_5], %15 {strides = array<i32>} : memref<16x128xf32, #tpu.memory_space<vmem>>, vector<16x128xf32>,
    } else {
    }
    %5 = arith.index_cast %arg0 : i32 to index
    %6 = memref.load %arg4[%5] : memref<2xi32, #tpu.memory_space<smem>>
    %7 = arith.cmpi slt, %arg1, %6 : i32
    %8 = arith.extui %7 : i1 to i32
    %c0_i32_2 = arith.constant 0 : i32
    %9 = arith.cmpi ne, %8, %c0_i32_2 : i32
    scf.if %9 {
      %c0 = arith.constant 0 : index
      %c0_5 = arith.constant 0 : index
      %15 = vector.load %arg5[%c0, %c0_5] : memref<16x128xbf16, #tpu.memory_space<vmem>>, vector<16x128xbf16>
      %c0_6 = arith.constant 0 : index
      %c0_7 = arith.constant 0 : index
      %c0_8 = arith.constant 0 : index
      %16 = vector.load %arg7[%c0_6, %c0_7, %c0_8] : memref<1x128x256xbf16, #tpu.memory_space<vmem>>, vector<1x128x256xbf16>
      %17 = vector.shape_cast %16 : vector<1x128x256xbf16> to vector<128x256xbf16>
      %cst = arith.constant dense<0.000000e+00> : vector<16x256xf32>
      %18 = tpu.matmul %15, %17, %cst {dimension_numbers = #tpu.dot_dimension_numbers<[1], [0], [0], [1], [0, 0, 1, 1], [], []>} : vector<16x128xbf16>, vector<128x256xbf16>, vector<16x256xf32> -> vector<16x256xf32>
      %19 = vector.extract_strided_slice %18 {offsets = [0, 0], sizes = [16, 128], strides = [1, 1]} : vector<16x256xf32> to vector<16x128xf32>
      %20 = vector.extract_strided_slice %18 {offsets = [0, 128], sizes = [16, 128], strides = [1, 1]} : vector<16x256xf32> to vector<16x128xf32>
      %21 = arith.negf %19 : vector<16x128xf32>
      %22 = math.exp %21 : vector<16x128xf32>
      %cst_9 = arith.constant 1.000000e+00 : f32
      %23 = vector.broadcast %cst_9 : f32 to vector<16x128xf32>
      %24 = arith.addf %23, %22 : vector<16x128xf32>
      %25 = arith.divf %23, %24 : vector<16x128xf32>
      %26 = arith.mulf %19, %25 : vector<16x128xf32>
      %27 = arith.mulf %26, %20 : vector<16x128xf32>
      %c0_10 = arith.constant 0 : index
      %c0_11 = arith.constant 0 : index
      %28 = vector.load %arg6[%c0_10, %c0_11] : memref<16x6xf32, #tpu.memory_space<vmem>>, vector<16x6xf32>
      %29 = tpu.iota {dimensions = array<i32: 1>} : vector<16x6xi32>
      %30 = vector.broadcast %arg1 : i32 to vector<16x6xi32>
      %31 = arith.cmpi eq, %29, %30 : vector<16x6xi32>
      %cst_12 = arith.constant 0.000000e+00 : f32
      %32 = vector.broadcast %cst_12 : f32 to vector<16x6xf32>
      %33 = arith.select %31, %28, %32 : vector<16x6xi1>, vector<16x6xf32>
      %cst_13 = arith.constant dense<0.000000e+00> : vector<16xf32>
      %34 = vector.multi_reduction <add>, %33, %cst_13 [1] : vector<16x6xf32> to vector<16xf32>
      %35 = vector.shape_cast %34 : vector<16xf32> to vector<16x1xf32>
      %36 = vector.broadcast %35 : vector<16x1xf32> to vector<16x128xf32>
      %37 = arith.mulf %27, %36 : vector<16x128xf32>
      %38 = arith.truncf %37 : vector<16x128xf32> to vector<16x128xbf16>
      %c0_14 = arith.constant 0 : index
      %c0_15 = arith.constant 0 : index
      %c0_16 = arith.constant 0 : index
      %39 = vector.load %arg8[%c0_14, %c0_15, %c0_16] : memref<1x128x128xbf16, #tpu.memory_space<vmem>>, vector<1x128x128xbf16>
      %40 = vector.shape_cast %39 : vector<1x128x128xbf16> to vector<128x128xbf16>
      %cst_17 = arith.constant dense<0.000000e+00> : vector<16x128xf32>
      %41 = tpu.matmul %38, %40, %cst_17 {dimension_numbers = #tpu.dot_dimension_numbers<[1], [0], [0], [1], [0, 0, 1, 1], [], []>} : vector<16x128xbf16>, vector<128x128xbf16>, vector<16x128xf32> -> vector<16x128xf32>
      %c0_18 = arith.constant 0 : index
      %c0_19 = arith.constant 0 : index
      %42 = vector.load %arg10[%c0_18, %c0_19] : memref<16x128xf32, #tpu.memory_space<vmem>>, vector<16x128xf32>
      %43 = arith.addf %42, %41 : vector<16x128xf32>
      %c0_20 = arith.constant 0 : index
      %c0_21 = arith.constant 0 : index
      %44 = vector.load %arg10[%c0_20, %c0_21] : memref<16x128xf32, #tpu.memory_space<vmem>>, vector<16x128xf32>
      tpu.vector_store %arg10[%c0_20, %c0_21], %43 {strides = array<i32>} : memref<16x128xf32, #tpu.memory_space<vmem>>, vector<16x128xf32>,
    } else {
    }
    %c5_i32 = arith.constant 5 : i32
    %10 = arith.cmpi eq, %arg1, %c5_i32 : i32
    %c0_i32_3 = arith.constant 0 : i32
    %11 = arith.cmpi eq, %arg2, %c0_i32_3 : i32
    %12 = arith.andi %10, %11 : i1
    %13 = arith.extui %12 : i1 to i32
    %c0_i32_4 = arith.constant 0 : i32
    %14 = arith.cmpi ne, %13, %c0_i32_4 : i32
    scf.if %14 {
      %c0 = arith.constant 0 : index
      %c0_5 = arith.constant 0 : index
      %15 = vector.load %arg10[%c0, %c0_5] : memref<16x128xf32, #tpu.memory_space<vmem>>, vector<16x128xf32>
      %c0_6 = arith.constant 0 : index
      %c0_7 = arith.constant 0 : index
      %16 = vector.load %arg9[%c0_6, %c0_7] : memref<16x128xf32, #tpu.memory_space<vmem>>, vector<16x128xf32>
      tpu.vector_store %arg9[%c0_6, %c0_7], %15 {strides = array<i32>} : memref<16x128xf32, #tpu.memory_space<vmem>>, vector<16x128xf32>,
    } else {
    }
    return
  }
  func.func @transform_0(%arg0: i32, %arg1: i32, %arg2: i32, %arg3: memref<12xi32, #tpu.memory_space<smem>>, %arg4: memref<2xi32, #tpu.memory_space<smem>>) -> (i32, i32) {
    %c0_i32 = arith.constant 0 : i32
    %c0_i32_0 = arith.constant 0 : i32
    return %arg0, %c0_i32 : i32, i32
  }
  func.func @transform_1(%arg0: i32, %arg1: i32, %arg2: i32, %arg3: memref<12xi32, #tpu.memory_space<smem>>, %arg4: memref<2xi32, #tpu.memory_space<smem>>) -> (i32, i32) {
    %c0_i32 = arith.constant 0 : i32
    %c0_i32_0 = arith.constant 0 : i32
    return %arg0, %c0_i32 : i32, i32
  }
  func.func @transform_2(%arg0: i32, %arg1: i32, %arg2: i32, %arg3: memref<12xi32, #tpu.memory_space<smem>>, %arg4: memref<2xi32, #tpu.memory_space<smem>>) -> (i32, i32, i32) {
    %c6_i32 = arith.constant 6 : i32
    %0 = arith.muli %arg0, %c6_i32 : i32
    %1 = arith.addi %0, %arg1 : i32
    %2 = arith.index_cast %1 : i32 to index
    %3 = memref.load %arg3[%2] : memref<12xi32, #tpu.memory_space<smem>>
    %c0_i32 = arith.constant 0 : i32
    %c0_i32_0 = arith.constant 0 : i32
    %c0_i32_1 = arith.constant 0 : i32
    return %3, %c0_i32, %c0_i32_0 : i32, i32, i32
  }
  func.func @transform_3(%arg0: i32, %arg1: i32, %arg2: i32, %arg3: memref<12xi32, #tpu.memory_space<smem>>, %arg4: memref<2xi32, #tpu.memory_space<smem>>) -> (i32, i32, i32) {
    %c6_i32 = arith.constant 6 : i32
    %0 = arith.muli %arg0, %c6_i32 : i32
    %1 = arith.addi %0, %arg1 : i32
    %2 = arith.index_cast %1 : i32 to index
    %3 = memref.load %arg3[%2] : memref<12xi32, #tpu.memory_space<smem>>
    %c0_i32 = arith.constant 0 : i32
    %c0_i32_0 = arith.constant 0 : i32
    %c0_i32_1 = arith.constant 0 : i32
    return %3, %c0_i32, %c0_i32_0 : i32, i32, i32
  }
  func.func @transform_4(%arg0: i32, %arg1: i32, %arg2: i32, %arg3: memref<12xi32, #tpu.memory_space<smem>>, %arg4: memref<2xi32, #tpu.memory_space<smem>>) -> (i32, i32) {
    %c0_i32 = arith.constant 0 : i32
    %c0_i32_0 = arith.constant 0 : i32
    return %arg0, %c0_i32 : i32, i32
  }
}

</mosaic_0001>

<bundles_post_ra>
// kernel: tpu_custom_call.1
= control target key start
LH: loop header
LB: loop body
LE: loop exit
PB: predicated region body
PF: predicated region fallthrough
CT: control target
= control target key end

     0   :  { %s1818_s0 = inlined_call_operand.vmem [shape: s32[12], index: 0, kind: input, shape index: {}]   ;;  %s1819_s2 = inlined_call_operand.vmem [shape: bf16[32,128], index: 2, kind: input, shape index: {}]   ;;  %s1820_s3 = inlined_call_operand.vmem [shape: f32[32,6], index: 3, kind: input, shape index: {}]   ;;  %s1821_s4 = inlined_call_operand.hbm [shape: bf16[6,128,256], index: 4, kind: input, shape index: {}]   ;;  %s1822_s5 = inlined_call_operand.hbm [shape: bf16[6,128,128], index: 5, kind: input, shape index: {}]   ;;  %s1823_s6 = inlined_call_operand.hbm [shape: f32[32,128], index: 6, kind: output, shape index: {}]   ;;  %s1824_s1 = inlined_call_operand.vmem [shape: s32[2], index: 1, kind: input, shape index: {}]  }
   0x1   :  { %1842 = sst [smem:[#allocation31_spill]] %s1823_s6  ;;  %s11_s23 = sshll.u32 %s1818_s0, 4  ;;  %s12_s23 = int_to_ptr.vmem [resolvable:$true] %s11_s23 }
   0x2   :  { %s15_s26 = sshll.u32 %s1824_s1, 4  ;;  %s1098_s27 = scalar_lea.vmem %s12_s23, 16  ;;  %s16_s26 = int_to_ptr.vmem [resolvable:$true] %s15_s26 }
   0x3   :  { %p1099_p0 = scmp.ne.s32.totalorder %s12_s23, %s1098_s27  ;;  %p1103_p1 = scmp.lt.s32.totalorder %s12_s23, %s12_s23 }
   0x4   :  { %p1104_p2 = scmp.lt.s32.totalorder %s1098_s27, %s1098_s27 }
   0x6   :  { %p1105_p3 = por %p1104_p2, %p1103_p1 }
   0x8   :  { %p1106_p4 = pnand %p1105_p3, %p1099_p0 }
   0xa   :  { %1109 = shalt.err (!%p1106_p4)  }
   0xb   :  { %s1336_s28 = smov [#allocation4]   ;;  %s1110_s29 = scalar_lea.vmem %s16_s26, 16 }
   0xc   :  { %14 = dma.vmem_to_smem %s12_s23, 16, %s1336_s28, [#allocation3] }
   0xd   :  { %p1111_p5 = scmp.ne.s32.totalorder %s16_s26, %s1110_s29  ;;  %p1115_p6 = scmp.lt.s32.totalorder %s16_s26, %s16_s26 }
   0xe   :  { %p1116_p7 = scmp.lt.s32.totalorder %s1110_s29, %s1110_s29 }
  0x10   :  { %p1117_p8 = por %p1116_p7, %p1115_p6 }
  0x12   :  { %p1118_p9 = pnand %p1117_p8, %p1111_p5 }
  0x14   :  { %1121 = shalt.err (!%p1118_p9)  }
  0x15   :  { %s1337_s0 = smov [#allocation5]  }
  0x16   :  { %18 = dma.vmem_to_smem %s16_s26, 16, %s1337_s0, [#allocation3] }
  0x17   :  { %1266 = dma.done.wait [#allocation3], 32 }
  0x18   :  { %1267 = vsyncadd [#allocation3], 4294967264 }
  0x19   :  { %20 = sfence }
  0x1a   :  { %21 = vsyncpa [#allocation7], 0 }
  0x1b   :  { %23 = vsyncpa [#allocation7 + $0x1], 0 }
  0x1c   :  { %24 = vsyncpa [#allocation10], 0 }
  0x1d   :  { %26 = vsyncpa [#allocation10 + $0x1], 0 }
  0x1e   :  { %27 = vsyncpa [#allocation8], 0 }
  0x1f   :  { %29 = vsyncpa [#allocation8 + $0x1], 0  ;;  %s1392_s1 = smov 0   ;;  %s1394_s30 = smov 0  }
  0x20   :  { %s1396_s7 = smov 0   ;;  %s1398_s8 = smov 0  }
  0x21   :  { %s1400_s9 = smov 0   ;;  %s1402_s10 = smov 0  }
  0x22   :  { %s1404_s11 = smov 0   ;;  %s1406_s12 = smov 0  }
  0x23   :  { %s1408_s13 = smov 0   ;;  %s1410_s14 = smov 0  }
  0x24   :  { %s1412_s15 = smov 0   ;;  %s1414_s16 = smov 0  }
  0x25   :  { %s1416_s17 = smov 0   ;;  %s1418_s18 = smov 0  }
  0x26 LB: > { %1843 = sst [smem:[#allocation20_spill]] %s1282_s1  ;;  %s1825_s19 = sadd.s32 4294967295, %s1334_s18   ;;  %s1334_s18 = sphi %s1418_s18, %s35_s18   ;;  %s1330_s17 = sphi %s1416_s17, %s1888_s17   ;;  %s1326_s16 = sphi %s1414_s16, %s1887_s16   ;;  %s1322_s15 = sphi %s1412_s15, %s1886_s15   ;;  %s1318_s14 = sphi %s1410_s14, %s1885_s14   ;;  %s1314_s13 = sphi %s1408_s13, %s1897_s13   ;;  %s1310_s12 = sphi %s1406_s12, %s1896_s12   ;;  %s1306_s11 = sphi %s1404_s11, %s1895_s11   ;;  %s1302_s10 = sphi %s1402_s10, %s1894_s10   ;;  %s1298_s9 = sphi %s1400_s9, %s1893_s9   ;;  %s1294_s8 = sphi %s1398_s8, %s1892_s8   ;;  %s1290_s7 = sphi %s1396_s7, %s1882_s7   ;;  %s1286_s30 = sphi %s1394_s30, %s1891_s30   ;;  %s1282_s1 = sphi %s1392_s1, %s1890_s1  }
  0x27   : > { %1844 = sst [smem:[#allocation21_spill]] %s1290_s7  ;;  %s50_s21 = sadd.s32 1, %s1326_s16 }
  0x28   : > { %1845 = sst [smem:[#allocation22_spill]] %s1314_s13  ;;  %s54_s22 = sadd.s32 1, %s1330_s17 }
  0x29   : > { %1846 = sst [smem:[#allocation23_spill]] %s1326_s16  ;;  %p52_p10 = scmp.ge.s32.totalorder %s50_s21, 6 }
  0x2a   : > { %1847 = sst [smem:[#allocation24_spill]] %s1330_s17  ;;  %s110_s23 = smul.u32 6, %s1330_s17 }
  0x2b   : > { %p126_p11 = scmp.ne.s32.totalorder %s1314_s13, %s1310_s12  ;;  %s1899_s21 = smov (%p52_p10, %s50_s21), 0 }
  0x2c   : > { %1848 = sst [smem:[#allocation25_spill]] %s1899_s21  ;;  %s1901_s22 = smov (!%p52_p10, %s54_s22), %s1330_s17 }
  0x2d   : > { %s1474_s25 = sadd.s32 %s1326_s16, %s110_s23  ;;  %p1838_p12 = scmp.eq.s32.totalorder %s1334_s18, 0 }
  0x2e   : > { %p56_p13 = scmp.ge.s32.totalorder %s1901_s22, 2  ;;  %s112_s26 = sld [smem:[#allocation4 + %s1474_s25]] }
  0x2f   : > { %p1480_p0 = por %p1838_p12, %p126_p11  ;;  %p132_p1 = scmp.ne.s32.totalorder %s1310_s12, %s1306_s11 }
  0x30   : > { %s1903_s22 = smov (%p56_p13, %s1901_s22), 0  ;;  %p1490_p2 = scmp.eq.s32.totalorder %s1825_s19, 0 }
  0x31   : > { %1850 = sst [smem:[#allocation26_spill]] %s1903_s22  ;;  %s113_s0 = smul.u32 6, %s1903_s22 }
  0x32   : > { %s1851_s28 = scalar_select %p1490_p2, 1, 0 }
  0x33   : > { %s1495_s29 = sld [smem:[#allocation4 + %s1474_s25]]  ;;  %s174_s23 = ssub.s32 %s1330_s17, %s1903_s22 }
  0x34   : > { %p1502_p3 = por %p1490_p2, %p132_p1  ;;  %p175_p4 = scmp.eq.s32.totalorder %s174_s23, 0 }
  0x35   : > { %s114_s24 = sadd.s32 %s113_s0, %s1899_s21  ;;  %s177_s20 = sadd.s32 1, %s1290_s7 }
  0x36   : > { %s1852_s11 = scalar_select %p1502_p3, 1, 0 }
  0x37   : > { %s115_s19 = sld [smem:[#allocation4 + %s114_s24]]  ;;  %p187_p5 = scmp.ne.s32.totalorder %s1290_s7, %s1286_s30 }
  0x38   : > { %s1508_s16 = sld [smem:[#allocation4 + %s114_s24]]  ;;  %s1854_s17 = sadd.s32 4294967295, %s1334_s18  }
  0x39   : > { %s1511_s22 = scalar_select %p175_p4, %s1290_s7, %s177_s20  }
  0x3a   : > { %p188_p6 = scmp.eq.s32.totalorder %s1854_s17, 11  ;;  %p193_p7 = scmp.ne.s32.totalorder %s1286_s30, %s1282_s1 }
  0x3b   : > { %1853 = sst [smem:[#allocation27_spill]] %s1511_s22  ;;  %s1855_s0 = sadd.s32 4294967294, %s1334_s18  }
  0x3c   : > { %p194_p8 = scmp.eq.s32.totalorder %s1855_s0, 11  ;;  %p1521_p9 = por %p188_p6, %p187_p5 }
  0x3d   : > { %p1837_p11 = scmp.lt.s32.totalorder %s1334_s18, 12  ;;  %s116_s20 = ssub.s32 %s112_s26, %s115_s19 }
  0x3e   : > { %s1856_s23 = scalar_select %p1521_p9, 1, 0 }
  0x3f   : > { %p1525_p10 = por %p194_p8, %p193_p7  ;;  %s232_s24 = sand.u32 1, %s1314_s13  }
  0x40   : > { %1857 = sst [smem:[#allocation28_spill]] %s1856_s23  ;;  %p117_p13 = scmp.eq.s32.totalorder %s116_s20, 0 }
  0x41   : > { %s1858_s21 = scalar_select %p1525_p10, 1, 0 }
  0x42   : > { %s823_s17 = sshll.u32 %s232_s24, 7  ;;  %p1535_p1 = pnand %p1837_p11, %p1480_p0 }
  0x43   : > { %1859 = sst [smem:[#allocation29_spill]] %s1858_s21  ;;  %s1861_s22 = sadd.s32 1, %s1314_s13 }
  0x44   : > { %s1542_s7 = scalar_select %p117_p13, %s1314_s13, %s1861_s22  }
  0x45   : > { %s906_s21 = scalar_select %p1480_p0, [#allocation4], [#allocation12] }
  0x46   : > { %1862 = sst [smem:[#allocation30_spill]] %s1542_s7  ;;  %s236_s19 = scalar_lea.vmem [#allocation6], %s823_s17 }
  0x47   : > { %s907_s1 = scalar_select %p1480_p0, %s1474_s25, 0 }
  0x48   : > { %s1905_s21 = smov (!%p1837_p11, %s906_s21), [#allocation14]  ;;  %s246_s26 = sshll.u32 %s236_s19, 4  ;;  %s1553_s26 = int_to_ptr.vmem [resolvable:$true] %s246_s26 }
  0x49   : > { %s1907_s1 = smov (!%p1837_p11, %s907_s1), 0  ;;  %p829_p4 = scmp.ge.s32.totalorder %s1334_s18, 1 }
  0x4a   : > { %s239_s20 = sld [smem:[%s1905_s21 + %s1907_s1]]  ;;  %p278_p5 = scmp.lt.s32.totalorder %s1334_s18, 13 }
  0x4b   : > { %s148_s27 = ssub.s32 %s1495_s29, %s1508_s16  ;;  %s1572_s21 = scalar_lea.sflag [#allocation7], %s232_s24 }
  0x4c   : > { %p1557_p6 = pnand %p829_p4, %p278_p5  ;;  %p1568_p0 = scmp.eq.s32.totalorder %s148_s27, 0 }
  0x4d   : > { %p1124_p8 = pneg %p1535_p1  ;;  %s1127_s13 = scalar_lea.hbm %s1821_s4, 12288 }
  0x4e   : > { %s1863_s22 = scalar_select %p1557_p6, 1, 0 }
  0x50   : > { %s872_s7 = sshll.u32 %s239_s20, 11 }
  0x51   : > { %s1566_s23 = scalar_lea.hbm %s1821_s4, %s872_s7 }
  0x52   : > { %s1122_s17 = scalar_lea.hbm %s1566_s23, 2048  ;;  %p1128_p5 = scmp.lt.u32.totalorder %s1566_s23, %s1821_s4 }
  0x53   : > { %p1123_p7 = scmp.ne.s32.totalorder %s1566_s23, %s1122_s17  ;;  %p1129_p11 = scmp.lt.u32.totalorder %s1127_s13, %s1122_s17 }
  0x54   : > { %p1131_p10 = scmp.lt.u32.totalorder %s1122_s17, %s1566_s23 }
  0x55   : > { %p1125_p13 = pnand %p1124_p8, %p1123_p7  ;;  %p1130_p12 = por %p1129_p11, %p1128_p5 }
  0x57   : > { %p1126_p4 = pneg %p1125_p13  ;;  %p1132_p9 = por %p1131_p10, %p1130_p12 }
  0x59   : > { %p1133_p3 = pnand %p1132_p9, %p1126_p4 }
  0x5b   : > { %1136 = shalt.err (!%p1133_p3)
}
  0x5c   : > { %s1137_s24 = scalar_lea.vmem %s1553_s26, 2048  ;;  %s1338_s19 = smov [#allocation6]  }
  0x5d   : > { %p1138_p7 = scmp.ne.s32.totalorder %s1553_s26, %s1137_s24  ;;  %s1142_s20 = sshll.u32 %s1338_s19, 4  ;;  %s1143_s20 = int_to_ptr.vmem [resolvable:$false] %s1142_s20 }
  0x5e   : > { %s1144_s27 = scalar_lea.vmem %s1143_s20, 4096  ;;  %p1145_p2 = scmp.lt.s32.totalorder %s1553_s26, %s1143_s20 }
  0x5f   : > { %p1140_p13 = pnand %p1138_p7, %p1124_p8  ;;  %p1146_p11 = scmp.lt.s32.totalorder %s1144_s27, %s1137_s24 }
  0x61   : > { %p1141_p6 = pneg %p1140_p13  ;;  %p1147_p5 = por %p1146_p11, %p1145_p2 }
  0x63   : > { %p1148_p12 = pnand %p1147_p5, %p1141_p6 }
  0x65   : > { %1151 = shalt.err (!%p1148_p12)
}
  0x66   : > { %s1339_s17 = smov 128   ;;  %s1340_s6 = smov 8  }
  0x67   : > { %921 = dma.hbm_to_vmem [thread:$0]  (!%p1535_p1), %s1566_s23, 2048, %s1553_s26, %s1572_s21, %s1339_s17, %s1339_s17, %s1340_s6  }
  0x68   : > { %s151_s7 = sadd.s32 1, %s1302_s10  ;;  %p158_p2 = scmp.ne.s32.totalorder %s1302_s10, %s1298_s9 }
  0x69   : > { %s1606_s13 = scalar_select %p1568_p0, %s1302_s10, %s151_s7  }
  0x6a   : > { %p164_p3 = scmp.ne.s32.totalorder %s1298_s9, %s1294_s8  ;;  %p1865_p9 = scmp.eq.s32.totalorder %s1334_s18, 0 }
  0x6b   : > { %s256_s16 = sand.u32 1, %s1302_s10   ;;  %p1866_p6 = scmp.ne.s32.totalorder %s1851_s28, 0 }
  0x6c   : > { %p160_p10 = por %p158_p2, %p1865_p9  ;;  %s826_s24 = sshll.u32 %s256_s16, 6 }
  0x6d   : > { %p1615_p8 = por %p164_p3, %p1866_p6  ;;  %p1868_p4 = scmp.lt.s32.totalorder %s1334_s18, 12 }
  0x6e   : > { %s909_s23 = scalar_select %p160_p10, [#allocation4], [#allocation13] }
  0x6f   : > { %p1621_p7 = pnand %p1868_p4, %p160_p10  ;;  %s1909_s25 = smov (!%p160_p10, %s1474_s25), 0 }
  0x70   : > { %p1870_p1 = pmov %p1868_p4  ;;  %s260_s28 = scalar_lea.vmem [#allocation9], %s826_s24 }
  0x71   : > { %s270_s0 = sshll.u32 %s260_s28, 4  ;;  %s1637_s27 = scalar_lea.sflag [#allocation10], %s256_s16  ;;  %s1630_s0 = int_to_ptr.vmem [resolvable:$true] %s270_s0 }
  0x72   : > { %s1911_s23 = smov (!%p1870_p1, %s909_s23), [#allocation15]  ;;  %p1871_p0 = pmov %p1870_p1 }
  0x73   : > { %p1154_p11 = pneg %p1621_p7  ;;  %s1157_s7 = scalar_lea.hbm %s1822_s5, 6144 }
  0x74   : > { %s1913_s25 = smov (!%p1871_p0, %s1909_s25), 0 }
  0x75   : > { %s263_s8 = sld [smem:[%s1911_s23 + %s1913_s25]] }
  0x7b   : > { %s873_s26 = sshll.u32 %s263_s8, 10 }
  0x7c   : > { %s1635_s20 = scalar_lea.hbm %s1822_s5, %s873_s26 }
  0x7d   : > { %s1152_s17 = scalar_lea.hbm %s1635_s20, 1024  ;;  %p1158_p2 = scmp.lt.u32.totalorder %s1635_s20, %s1822_s5 }
  0x7e   : > { %p1153_p13 = scmp.ne.s32.totalorder %s1635_s20, %s1152_s17  ;;  %p1159_p3 = scmp.lt.u32.totalorder %s1157_s7, %s1152_s17 }
  0x7f   : > { %p1161_p10 = scmp.lt.u32.totalorder %s1152_s17, %s1635_s20 }
  0x80   : > { %p1155_p5 = pnand %p1154_p11, %p1153_p13  ;;  %p1160_p9 = por %p1159_p3, %p1158_p2 }
  0x82   : > { %p1156_p12 = pneg %p1155_p5  ;;  %p1162_p6 = por %p1161_p10, %p1160_p9 }
  0x84   : > { %p1163_p4 = pnand %p1162_p6, %p1156_p12 }
  0x86   : > { %1166 = shalt.err (!%p1163_p4)
}
  0x87   : > { %s1167_s16 = scalar_lea.vmem %s1630_s0, 1024  ;;  %s1341_s8 = smov [#allocation9]  }
  0x88   : > { %p1168_p1 = scmp.ne.s32.totalorder %s1630_s0, %s1167_s16  ;;  %s1172_s28 = sshll.u32 %s1341_s8, 4  ;;  %s1173_s28 = int_to_ptr.vmem [resolvable:$false] %s1172_s28 }
  0x89   : > { %s1174_s26 = scalar_lea.vmem %s1173_s28, 2048  ;;  %p1175_p5 = scmp.lt.s32.totalorder %s1630_s0, %s1173_s28 }
  0x8a   : > { %p1170_p0 = pnand %p1168_p1, %p1154_p11  ;;  %p1176_p2 = scmp.lt.s32.totalorder %s1174_s26, %s1167_s16 }
  0x8c   : > { %p1171_p13 = pneg %p1170_p0  ;;  %p1177_p3 = por %p1176_p2, %p1175_p5 }
  0x8e   : > { %p1178_p9 = pnand %p1177_p3, %p1171_p13 }
  0x90   : > { %1181 = shalt.err (!%p1178_p9)
}
  0x91   : > { %s1342_s1 = smov 64   ;;  %s1343_s21 = smov 4  }
  0x92   : > { %926 = dma.hbm_to_vmem [thread:$0]  (!%p1621_p7), %s1635_s20, 1024, %s1630_s0, %s1637_s27, %s1342_s1, %s1342_s1, %s1343_s21  }
  0x93   : > { %p1872_p11 = scmp.ne.s32.totalorder %s1863_s22, 0 }
  0x94   : > { %s284_s17 = sand.u32 (!%p1872_p11), 1, %s1310_s12   ;;  %p1873_p12 = scmp.ne.s32.totalorder (!%p1872_p11), %s1852_s11, 0 }
  0x95   : > { %282 = sbr.rel (%p1872_p11) target bundleno = 716 (0x2cc), region = 36  ;;  %s830_s25 = sshll.u32 (!%p1872_p11), %s284_s17, 7 }
  0x96   : > { %s285_s6 = scalar_lea.sflag (!%p1872_p11), [#allocation7], %s284_s17  ;;  %s1668_s7 = scalar_lea.vmem (!%p1872_p11), [#allocation6], %s830_s25 }
  0x9c   : > { %1269 = dma.done.wait (%p1873_p12), %s285_s6, 2048  }
  0x9d   : > { %1271 = vsyncadd (%p1873_p12), %s285_s6, 4294965248  ;;  %s293_s24 = sand.u32 1, %s1298_s9  }
  0x9e   : > { %s831_s19 = sshll.u32 %s293_s24, 6  ;;  %s294_s0 = scalar_lea.sflag [#allocation10], %s293_s24 }
  0x9f   : > { %s1675_s20 = scalar_lea.vmem [#allocation9], %s831_s19 }
  0xa0   : > { %1273 = dma.done.wait (%p1615_p8), %s294_s0, 1024  }
  0xa1   : > { %1275 = vsyncadd (%p1615_p8), %s294_s0, 4294966272  ;;  %s334_s22 = sand.u32 1, %s1286_s30   ;;  %s833_s27 = sshll.u32 %s1322_s15, 1 }
  0xa2   : > { %s832_s11 = sshll.u32 %s334_s22, 4  ;;  %p338_p7 = scmp.lt.s32.totalorder %s833_s27, 3 }
  0xa3   : > { %p357_p10 = scmp.eq.s32.totalorder %s1318_s14, 0  ;;  %s1696_s17 = scalar_lea.vmem [#allocation11], %s832_s11 }
  0xa4   : > { %s1915_s27 = smov (!%p338_p7, %s833_s27), 3  ;;  %v1344_v0 = vmov (%p357_p10), 0.0  }
  0xa5   : > { %s834_s23 = sshll.u32 %s1915_s27, 2  ;;  %s836_s16 = sshll.u32 %s1915_s27, 3  ;;  %363 = vst [vmem:[#allocation2] sm:$0xff] (%p357_p10), %v1344_v0  ;;  %364 = vst [vmem:[#allocation2 + $0x8] sm:$0xff] (%p357_p10), %v1344_v0 }
  0xa6   : > { %s1689_s26 = scalar_lea.vmem %s1819_s2, %s834_s23  ;;  %s1694_s21 = scalar_lea.vmem %s1820_s3, %s836_s16 }
  0xa7   : > { %362 = sbr.rel (!%p357_p10) target bundleno = 174 (0xae), region = 48 }
  0xae PF: > { %s365_s25 = sld [smem:[#allocation5 + %s1322_s15]] }
  0xb4   : > { %p838_p8 = scmp.ge.s32.totalorder %s1318_s14, %s365_s25 }
  0xb5   : > { %v1057_v1 = vld [vmem:[%s1668_s7 + $0x4] ss:$8 sps:$4 sm:$0xff] (!%p838_p8)   ;;  %v1059_v2 = vld [vmem:[%s1668_s7] ss:$8 sps:$4 sm:$0xff] (!%p838_p8)   ;;  %v1345_v3 = vmov (!%p838_p8), 0   ;;  %v535_v4 = vlaneseq (!%p838_p8)  ;;  %v537_v9 = vstv (!%p838_p8), %s1318_s14  ;;  %vm541_vm1 = vcmask (!%p838_p8), 48128  }
  0xb6   : > { %369 = sbr.rel (%p838_p8) target bundleno = 679 (0x2a7), region = 52  ;;  %506 = vmatprep.mubr.bf16.mxu0 (!%p838_p8), %v1345_v3  ;;  %474 = vmatprep.subr.bf16.mxu0 (!%p838_p8), %v1057_v1  ;;  %v1060_v5 = vld [vmem:[%s1668_s7 + $0x14] ss:$8 sps:$4 sm:$0xff] (!%p838_p8)   ;;  %v1062_v6 = vld [vmem:[%s1668_s7 + $0x10] ss:$8 sps:$4 sm:$0xff] (!%p838_p8)   ;;  %v1082_v28 = vld [vmem:[%s1675_s20] sm:$0xff] (!%p838_p8)  }
  0xb7   : > { %475 = vmatpush1.bf16.msra.mxu0 (!%p838_p8), %v1059_v2  ;;  %v1063_v7 = vld [vmem:[%s1668_s7 + $0x24] ss:$8 sps:$4 sm:$0xff] (!%p838_p8)   ;;  %v536_v8 = vand.u32 (!%p838_p8), 127, %v535_v4  ;;  %v1065_v10 = vld [vmem:[%s1668_s7 + $0x20] ss:$8 sps:$4 sm:$0xff] (!%p838_p8)   ;;  %v533_v14 = vld [vmem:[%s1694_s21] sm:$0xff] (!%p838_p8) }
  0xb8   : > { %476 = vmatprep.subr.bf16.mxu0 (!%p838_p8), %v1060_v5  ;;  %v1066_v11 = vld [vmem:[%s1668_s7 + $0x34] ss:$8 sps:$4 sm:$0xff] (!%p838_p8)   ;;  %v1068_v12 = vld [vmem:[%s1668_s7 + $0x30] ss:$8 sps:$4 sm:$0xff] (!%p838_p8)   ;;  %v1069_v13 = vld [vmem:[%s1668_s7 + $0x44] ss:$8 sps:$4 sm:$0xff] (!%p838_p8)  }
  0xb9   : > { %vm538_vm0 = vcmp.eq.s32.totalorder (!%p838_p8), %v536_v8, %v537_v9  ;;  %v534_v16 = vld [vmem:[%s1694_s21 + $0x8] sm:$0xff] (!%p838_p8)  ;;  %v1071_v17 = vld [vmem:[%s1668_s7 + $0x40] ss:$8 sps:$4 sm:$0xff] (!%p838_p8)   ;;  %v1075_v23 = vld [vmem:[%s1668_s7 + $0x64] ss:$8 sps:$4 sm:$0xff] (!%p838_p8)   ;;  %v1346_v29 = vmov (!%p838_p8), 0.0  }
  0xba   : > { %v539_v15 = vsel (!%p838_p8), %vm538_vm0, %v533_v14, 0.0  ;;  %v540_v19 = vsel (!%p838_p8), %vm538_vm0, %v534_v16, 0.0  ;;  %v1072_v20 = vld [vmem:[%s1668_s7 + $0x54] ss:$8 sps:$4 sm:$0xff] (!%p838_p8)   ;;  %v1074_v22 = vld [vmem:[%s1668_s7 + $0x50] ss:$8 sps:$4 sm:$0xff] (!%p838_p8)   ;;  %886 = vmatprep.subr.bf16.mxu1 (!%p838_p8), %v1346_v29 }
  0xbb   : > { %477 = vmatpush1.bf16.msra.mxu0 (!%p838_p8), %v1062_v6  ;;  %v542_v18 = vsel (!%p838_p8), %vm541_vm1, %v539_v15, 0.0  ;;  %v545_v21 = vsel (!%p838_p8), %vm541_vm1, %v540_v19, 0.0  ;;  %v1077_v24 = vld [vmem:[%s1668_s7 + $0x60] ss:$8 sps:$4 sm:$0xff] (!%p838_p8)   ;;  %v1078_v25 = vld [vmem:[%s1668_s7 + $0x74] ss:$8 sps:$4 sm:$0xff] (!%p838_p8)   ;;  %887 = vmatpush3.bf16.msra.mxu1 (!%p838_p8), %v1082_v28 }
  0xbc   : > { %478 = vmatprep.subr.bf16.mxu0 (!%p838_p8), %v1063_v7  ;;  %543 = vadd.xlane.f32.xlu0 (!%p838_p8), %v542_v18  ;;  %v1080_v26 = vld [vmem:[%s1668_s7 + $0x70] ss:$8 sps:$4 sm:$0xff] (!%p838_p8)   ;;  %v1083_v30 = vld [vmem:[%s1675_s20 + $0x8] sm:$0xff] (!%p838_p8)   ;;  %v1086_v33 = vld [vmem:[%s1675_s20 + $0x20] sm:$0xff] (!%p838_p8)   ;;  %vm1347_vm2 = vmmov (!%p838_p8), 0  }
  0xbd   : > { %v1081_v27 = vld [vmem:[%s1689_s26] sm:$0xff]   ;;  %888 = vmatprep.subr.bf16.mxu1 %v1346_v29  ;;  %v1085_v32 = vld [vmem:[%s1675_s20 + $0x18] sm:$0xff]   ;;  %v1087_v34 = vld [vmem:[%s1675_s20 + $0x28] sm:$0xff]   ;;  %902 = vmatprep.mubr.msk.bf16.mxu1 %vm1347_vm2, %v1346_v29 }
  0xbe   : > { %v1084_v31 = vld [vmem:[%s1675_s20 + $0x10] sm:$0xff]   ;;  %v1089_v36 = vld [vmem:[%s1675_s20 + $0x38] sm:$0xff]  }
  0xbf   : > { %479 = vmatpush1.bf16.msra.mxu0 %v1065_v10  ;;  %889 = vmatpush3.bf16.msra.mxu1 %v1083_v30  ;;  %v1088_v35 = vld [vmem:[%s1675_s20 + $0x30] sm:$0xff]   ;;  %v657_v60 = vld [vmem:[#allocation2 + $0x8] sm:$0xff] }
  0xc0   : > { %480 = vmatprep.subr.bf16.mxu0 %v1066_v11  ;;  %546 = vadd.xlane.f32.xlu0 %v545_v21  ;;  %v656_v58 = vld [vmem:[#allocation2] sm:$0xff] }
  0xc1   : > { %890 = vmatprep.subr.bf16.mxu1 %v1346_v29 }
  0xc3   : > { %481 = vmatpush1.bf16.msra.mxu0 %v1068_v12  ;;  %891 = vmatpush3.bf16.msra.mxu1 %v1084_v31 }
  0xc4   : > { %482 = vmatprep.subr.bf16.mxu0 %v1069_v13  ;;  %892 = vmatprep.subr.bf16.mxu1 %v1346_v29 }
  0xc7   : > { %483 = vmatpush1.bf16.msra.mxu0 %v1071_v17  ;;  %893 = vmatpush3.bf16.msra.mxu1 %v1085_v32 }
  0xc8   : > { %484 = vmatprep.subr.bf16.mxu0 %v1072_v20  ;;  %894 = vmatprep.subr.bf16.mxu1 %v1346_v29 }
  0xcb   : > { %485 = vmatpush1.bf16.msra.mxu0 %v1074_v22  ;;  %895 = vmatpush3.bf16.msra.mxu1 %v1086_v33 }
  0xcc   : > { %486 = vmatprep.subr.bf16.mxu0 %v1075_v23  ;;  %896 = vmatprep.subr.bf16.mxu1 %v1346_v29 }
  0xcf   : > { %487 = vmatpush1.bf16.msra.mxu0 %v1077_v24  ;;  %897 = vmatpush3.bf16.msra.mxu1 %v1087_v34 }
  0xd0   : > { %488 = vmatprep.subr.bf16.mxu0 %v1078_v25  ;;  %898 = vmatprep.subr.bf16.mxu1 %v1346_v29 }
  0xd3   : > { %489 = vmatpush1.bf16.msra.mxu0 %v1080_v26  ;;  %899 = vmatpush3.bf16.msra.mxu1 %v1088_v35 }
  0xd4   : > { %900 = vmatprep.subr.bf16.mxu1 %v1346_v29 }
  0xd6   : > { %507 = vmatmul.mubr.bf16.vlgmr.msra.gmra.mrb[0].mxu0 %v1081_v27 }
  0xd7   : > { %901 = vmatpush3.bf16.msra.mxu1 %v1089_v36 }
 0x149   : > { %v544_v47 = vpop.xlane.xlu0 %543 }
 0x14d   : > { %v547_v53 = vpop.xlane.xlu0 %546 }
 0x1a9   : > { %v508_v37 = vpop.f32.mrb[0].mxu0 }
 0x1aa   : > { %v856_v38 = vmul.f32 -1.442695, %v508_v37  ;;  %v510_v39 = vpop.f32.mrb[1].mxu0 }
 0x1ab   : > { %v512_v40 = vpop.f32.mrb[2].mxu0 }
 0x1ac   : > { %1090 = vpow2.f32 %v856_v38  ;;  %v857_v41 = vmul.f32 -1.442695, %v512_v40  ;;  %v514_v42 = vpop.f32.mrb[3].mxu0 }
 0x1ae   : > { %1092 = vpow2.f32 %v857_v41 }
 0x1b6   : > { %v1091_v43 = vpop.eup %1090 }
 0x1b7   : > { %v523_v44 = vadd.f32 1.0, %v1091_v43 }
 0x1b8   : > { %v1093_v45 = vpop.eup %1092 }
 0x1b9   : > { %1094 = vrcp.f32 %v523_v44  ;;  %v524_v46 = vadd.f32 1.0, %v1093_v45 }
 0x1bb   : > { %1096 = vrcp.f32 %v524_v46 }
 0x1c3   : > { %v1095_v48 = vpop.eup %1094 }
 0x1c4   : > { %v529_v49 = vmul.f32 %v1095_v48, %v508_v37 }
 0x1c5   : > { %v1097_v50 = vpop.eup %1096 }
 0x1c6   : > { %v531_v51 = vmul.f32 %v529_v49, %v510_v39  ;;  %v530_v52 = vmul.f32 %v1097_v50, %v512_v40 }
 0x1c8   : > { %v532_v54 = vmul.f32 %v530_v52, %v514_v42  ;;  %v548_v55 = vmul.f32 %v544_v47, %v531_v51 }
 0x1ca   : > { %v549_v56 = vmul.f32 %v547_v53, %v532_v54 }
 0x1cc   : > { %v550_v57 = vpack.c.bf16 %v549_v56, %v548_v55 }
 0x1ce   : > { %903 = vmatmul.mubr.bf16.vlgmr.msra.gmra.mrb[0].mxu1 %v550_v57 }
 0x2a1   : > { %v649_v59 = vpop.f32.mrb[0].mxu1 }
 0x2a2   : > { %v658_v61 = vadd.f32 %v656_v58, %v649_v59  ;;  %v904_v62 = vpop.f32.mrb[1].mxu1 }
 0x2a3   : > { %v652_v63 = vpop.f32.mrb[2].mxu1 }
 0x2a4   : > { %660 = vst [vmem:[#allocation2] sm:$0xff] %v658_v61  ;;  %v659_v0 = vadd.f32 %v657_v60, %v652_v63  ;;  %v905_v1 = vpop.f32.mrb[3].mxu1 }
 0x2a6   : > { %661 = vst [vmem:[#allocation2 + $0x8] sm:$0xff] %v659_v0 }
 0x2a7 PF: > { %p662_p6 = scmp.eq.s32.totalorder %s1318_s14, 5 }
 0x2a9   : > { %666 = sbr.rel (!%p662_p6) target bundleno = 688 (0x2b0), region = 56 }
 0x2ab   : > { %v667_v2 = vld [vmem:[#allocation2] sm:$0xff] (%p662_p6) }
 0x2ac   : > { %669 = vst [vmem:[%s1696_s17] sm:$0xff] (%p662_p6), %v667_v2 }
 0x2ad   : > { %v668_v3 = vld [vmem:[#allocation2 + $0x8] sm:$0xff] (%p662_p6) }
 0x2ae   : > { %670 = vst [vmem:[%s1696_s17 + $0x8] sm:$0xff] (%p662_p6), %v668_v3 }
 0x2b0 PF: > { %s1874_s6 = sld [smem:[#allocation28_spill]]  ;;  %s876_s7 = sshll.u32 %s1322_s15, 8 }
 0x2b1   : > { %s1875_s0 = sld [smem:[#allocation31_spill]]  ;;  %s685_s27 = sshll.u32 %s1696_s17, 4  ;;  %s1738_s27 = int_to_ptr.vmem [resolvable:$true] %s685_s27 }
 0x2b2   : > { %s1742_s14 = scalar_lea.sflag [#allocation8], %s334_s22  ;;  %s1182_s11 = scalar_lea.vmem %s1738_s27, 256 }
 0x2b3   : > { %p1183_p4 = scmp.ne.s32.totalorder %s1738_s27, %s1182_s11  ;;  %s1348_s15 = smov [#allocation11]  }
 0x2b4   : > { %s1186_s23 = sshll.u32 %s1348_s15, 4  ;;  %s1187_s23 = int_to_ptr.vmem [resolvable:$false] %s1186_s23 }
 0x2b5   : > { %s1188_s16 = scalar_lea.vmem %s1187_s23, 512  ;;  %p1189_p5 = scmp.lt.s32.totalorder %s1738_s27, %s1187_s23 }
 0x2b6   : > { %p1876_p1 = scmp.ne.s32.totalorder %s1874_s6, 0  ;;  %p1190_p2 = scmp.lt.s32.totalorder %s1188_s16, %s1182_s11 }
 0x2b7   : > { %s1735_s20 = scalar_lea.hbm %s1875_s0, %s876_s7 }
 0x2b8   : > { %p1184_p0 = pnand %p1183_p4, %p1876_p1  ;;  %p1191_p3 = por %p1190_p2, %p1189_p5 }
 0x2ba   : > { %p1185_p13 = pneg %p1184_p0 }
 0x2bc   : > { %p1192_p9 = pnand %p1191_p3, %p1185_p13 }
 0x2be   : > { %1195 = shalt.err (!%p1192_p9)
}
 0x2bf   : > { %s1196_s22 = scalar_lea.hbm %s1735_s20, 256  ;;  %s1200_s26 = scalar_lea.hbm %s1875_s0, 512 }
 0x2c0   : > { %p1197_p11 = scmp.ne.s32.totalorder %s1735_s20, %s1196_s22  ;;  %p1201_p10 = scmp.lt.u32.totalorder %s1735_s20, %s1875_s0 }
 0x2c1   : > { %p1202_p8 = scmp.lt.u32.totalorder %s1200_s26, %s1196_s22  ;;  %p1204_p4 = scmp.lt.u32.totalorder %s1196_s22, %s1735_s20 }
 0x2c2   : > { %p1198_p12 = pnand %p1197_p11, %p1876_p1 }
 0x2c3   : > { %p1203_p6 = por %p1202_p8, %p1201_p10 }
 0x2c4   : > { %p1199_p7 = pneg %p1198_p12 }
 0x2c5   : > { %p1205_p0 = por %p1204_p4, %p1203_p6 }
 0x2c7   : > { %p1206_p13 = pnand %p1205_p0, %p1199_p7 }
 0x2c9   : > { %1209 = shalt.err (!%p1206_p13)
}
 0x2ca   : > { %s1349_s21 = smov 128   ;;  %s1350_s17 = smov 8  }
 0x2cb   : > { %914 = dma.vmem_to_hbm [thread:$0]  (%p1876_p1), %s1738_s27, 256, %s1735_s20, %s1742_s14, %s1349_s21, %s1349_s21, %s1350_s17  }
 0x2cc PF: > { %s1877_s25 = sld [smem:[#allocation20_spill]]  ;;  %s1878_s7 = sld [smem:[#allocation29_spill]] }
 0x2cd   : > { %p932_p5 = scmp.ge.s32.totalorder %s1334_s18, 2 }
 0x2d2   : > { %s700_s24 = sand.u32 1, %s1877_s25   ;;  %p1879_p2 = scmp.ne.s32.totalorder %s1878_s7, 0 }
 0x2d3   : > { %s701_s19 = scalar_lea.sflag [#allocation8], %s700_s24 }
 0x2d4   : > { %p928_p3 = pnand %p932_p5, %p1879_p2 }
 0x2d6   : > { %1277 = dma.done.wait (!%p928_p3), %s701_s19, 256  }
 0x2d7   : > { %1279 = vsyncadd (!%p928_p3), %s701_s19, 4294967040  ;;  %s35_s18 = sadd.s32 1, %s1334_s18   ;;  %s1881_s6 = sld [smem:[#allocation21_spill]] }
 0x2d8   : > { %p1771_p9 = scmp.ge.s32.totalorder %s35_s18, 14   ;;  %s1882_s7 = sld [smem:[#allocation27_spill]] }
 0x2d9   : > { %s1883_s20 = sld [smem:[#allocation22_spill]]  ;;  %s1884_s27 = sld [smem:[#allocation30_spill]] }
 0x2da   : > { %s1885_s14 = sld [smem:[#allocation23_spill]]  ;;  %s1886_s15 = sld [smem:[#allocation24_spill]] }
 0x2db   : > { %s1887_s16 = sld [smem:[#allocation25_spill]]  ;;  %s1888_s17 = sld [smem:[#allocation26_spill]] }
 0x2dc   : > { %s1890_s1 = smov %s1286_s30  ;;  %s1892_s8 = smov %s1298_s9 }
 0x2dd   : > { %s1891_s30 = smov %s1881_s6  ;;  %s1893_s9 = smov %s1302_s10 }
 0x2de   : > { %s1894_s10 = smov %s1606_s13  ;;  %s1895_s11 = smov %s1310_s12 }
 0x2df   : > { %s1896_s12 = smov %s1883_s20  ;;  %s1897_s13 = smov %s1884_s27 }
 0x2e0   :  { %34 = sbr.rel (!%p1771_p9) target bundleno = 38 (0x26), region = 112 }
 0x2e7   :  { %706 = vsyncpa [#allocation7], 1 }
 0x2e8   :  { %708 = vsyncpa [#allocation7 + $0x1], 1 }
 0x2e9   :  { %709 = vsyncpa [#allocation10], 1 }
 0x2ea   :  { %711 = vsyncpa [#allocation10 + $0x1], 1 }
 0x2eb   :  { %712 = vsyncpa [#allocation8], 1 }
 0x2ec   :  { %714 = vsyncpa [#allocation8 + $0x1], 1 }

</bundles_post_ra>
